<compile_context>
chip_gen: v7x
topology: tpu7x:2x2x1
jax: 0.10.0
libtpu: 0.0.40
codegen_flags: <defaults>
</compile_context>

<pallas_src>
import functools

import jax
import jax.numpy as jnp
from jax.experimental import pallas as pl
from jax.experimental.pallas import tpu as pltpu


def _round_up(x, m):
    return (x + m - 1) // m * m


def _embed_kernel(*refs, num_embeddings, keep_threshold, scale):
    """refs = (ids_ref, table_ref[, bits_ref], out_ref)."""
    if keep_threshold is None:
        ids_ref, table_ref, out_ref = refs
        bits_ref = None
    else:
        ids_ref, table_ref, bits_ref, out_ref = refs

    ids = ids_ref[...]                     # (T, 1) int32 token ids for this tile
    table = table_ref[...]                 # (V, D), VMEM-resident across the grid
    t = ids.shape[0]

    # Gather rows via a one-hot matmul on the MXU (exact: one nonzero per row).
    iota = jax.lax.broadcasted_iota(jnp.int32, (t, num_embeddings), 1)
    one_hot = (ids == iota).astype(table.dtype)                    # (T, V)
    rows = jnp.dot(one_hot, table,
                   preferred_element_type=jnp.float32,
                   precision=jax.lax.Precision.HIGHEST)            # (T, D)

    if bits_ref is not None:
        # Inverted dropout: integer-domain keep test, single constant scale.
        keep = bits_ref[...] >= jnp.int32(keep_threshold)          # (T, D)
        rows = jnp.where(keep, rows * scale, 0.0)

    out_ref[...] = rows.astype(out_ref.dtype)


def embedding_forward(ids, emb_matrix, *, p=0.3, training=False, rng_key=None,
                      tile=512):
    """ids: (B, S) int; emb_matrix: (V, D) float -> (B, S, D) float."""
    B, S = ids.shape
    V, D = emb_matrix.shape
    out_dtype = emb_matrix.dtype

    # Clamp so an out-of-range id can never produce garbage.
    flat = jnp.clip(ids.reshape(-1).astype(jnp.int32), 0, V - 1)
    N = flat.shape[0]

    # Token tile size: multiple of 8, capped at `tile` (512 fits v5e..v7x).
    T = min(int(tile), _round_up(N, 8))
    N_pad = _round_up(N, T)
    num_tiles = N_pad // T
    flat = jnp.pad(flat, (0, N_pad - N)).reshape(N_pad, 1)

    use_dropout = bool(training) and float(p) > 0.0
    keep_threshold = None
    scale = 1.0

    inputs = [flat, emb_matrix]
    in_specs = [
        pl.BlockSpec((T, 1), lambda i: (i, 0)),    # token ids for this tile
        pl.BlockSpec((V, D), lambda i: (0, 0)),    # whole table, stays resident
    ]
    if use_dropout:
        if rng_key is None:
            rng_key = jax.random.PRNGKey(0)
        # 24-bit uniform integers in [0, 2^24); element is dropped iff r < p*2^24.
        raw = jax.random.bits(rng_key, (N_pad, D), dtype=jnp.uint32)
        rand24 = jax.lax.shift_right_logical(raw, jnp.uint32(8)).astype(jnp.int32)
        keep_threshold = min(int(round(float(p) * float(1 << 24))), (1 << 24) - 1)
        scale = 1.0 / (1.0 - float(p))
        inputs.append(rand24)
        in_specs.append(pl.BlockSpec((T, D), lambda i: (i, 0)))

    kernel = functools.partial(
        _embed_kernel,
        num_embeddings=V,
        keep_threshold=keep_threshold,
        scale=scale,
    )

    itemsize = jnp.dtype(out_dtype).itemsize
    table_bytes = V * D * itemsize
    # Double-buffered VMEM budget: table + out tile + ids (+ dropout bits).
    vmem_need = 2 * (table_bytes + T * D * itemsize + T * 4
                     + (T * D * 4 if use_dropout else 0)) + (1 << 20)
    vmem_limit = int(min(64 * 1024 * 1024, max(vmem_need, 8 * 1024 * 1024)))
    # TODO(synk): tables too large for VMEM should fall back to a manually
    # double-buffered per-tile row-gather DMA path (memory_space=pl.ANY).

    cost = pl.CostEstimate(
        flops=2 * N_pad * V * D,
        transcendentals=0,
        bytes_accessed=(table_bytes + N_pad * 4 + N_pad * D * itemsize
                        + (N_pad * D * 4 if use_dropout else 0)),
    )

    out = pl.pallas_call(
        kernel,
        out_shape=jax.ShapeDtypeStruct((N_pad, D), out_dtype),
        grid=(num_tiles,),
        in_specs=in_specs,
        out_specs=pl.BlockSpec((T, D), lambda i: (i, 0)),
        compiler_params=pltpu.CompilerParams(
            dimension_semantics=("parallel",),
            vmem_limit_bytes=vmem_limit,
        ),
        cost_estimate=cost,
    )(*inputs)

    return out[:N].reshape(B, S, D)


if __name__ == "__main__":
    key = jax.random.PRNGKey(0)
    k_emb, k_ids, k_drop = jax.random.split(key, 3)

    V, D = 64, 128          # num_embeddings, embedding_dim
    B, S = 2, 8             # batch, sequence length

    # Mirrors torch.nn.init.uniform_(FloatTensor(V, D), a=-0.15, b=0.15).
    emb_matrix = jax.random.uniform(
        k_emb, (V, D), dtype=jnp.float32, minval=-0.15, maxval=0.15)
    ids = jax.random.randint(k_ids, (B, S), 0, V, dtype=jnp.int32)
    # TODO(synk): padding_idx / max_norm / scale_grad_by_freq / sparse are
    # None/False by default in the module and are not modeled here.

    # Eval-mode forward (dropout is identity).
    out_eval = jax.block_until_ready(
        embedding_forward(ids, emb_matrix, p=0.3, training=False))

    # Training-mode forward (stochastic inverted dropout, p=0.3).
    out_train = jax.block_until_ready(
        embedding_forward(ids, emb_matrix, p=0.3, training=True, rng_key=k_drop))

    ref = emb_matrix[ids]
    assert out_eval.shape == (B, S, D)
    assert out_train.shape == (B, S, D)
    assert jnp.allclose(out_eval, ref, atol=1e-3), "embedding lookup mismatch"

    # Train-mode elements are either dropped (0) or scaled by 1/(1-p).
    scaled = ref / (1.0 - 0.3)
    ok = jnp.all((jnp.abs(out_train) <= 1e-6)
                 | (jnp.abs(out_train - scaled) <= 1e-3))
    assert bool(ok), "dropout semantics mismatch"

    print("KERNEL_OK")
</pallas_src>

<mosaic_0001>
module attributes {stable_mosaic.version = 11 : i64} {
  func.func @_embed_kernel(%arg0: i32, %arg1: memref<16x1xi32, #tpu.memory_space<vmem>>, %arg2: memref<64x128xf32, #tpu.memory_space<vmem>>, %arg3: memref<16x128xf32, #tpu.memory_space<vmem>>) attributes {dimension_semantics = [#tpu.dimension_semantics<parallel>], iteration_bounds = array<i64: 1>, scalar_prefetch = 0 : i64, scratch_operands = 0 : i64, tpu.core_type = #tpu.core_type<tc>, window_params = [{transform_indices = @transform_0, window_bounds = array<i64: 16, 1>}, {pipeline_mode = #tpu.pipeline_mode<synchronous>, transform_indices = @transform_1, window_bounds = array<i64: 64, 128>}, {transform_indices = @transform_2, window_bounds = array<i64: 16, 128>}]} {
    %c0 = arith.constant 0 : index
    %c0_0 = arith.constant 0 : index
    %0 = vector.load %arg1[%c0, %c0_0] : memref<16x1xi32, #tpu.memory_space<vmem>>, vector<16x1xi32>
    %c0_1 = arith.constant 0 : index
    %c0_2 = arith.constant 0 : index
    %1 = vector.load %arg2[%c0_1, %c0_2] : memref<64x128xf32, #tpu.memory_space<vmem>>, vector<64x128xf32>
    %2 = tpu.iota {dimensions = array<i32: 1>} : vector<16x64xi32>
    %3 = vector.broadcast %0 : vector<16x1xi32> to vector<16x64xi32>
    %4 = arith.cmpi eq, %3, %2 : vector<16x64xi32>
    %5 = arith.extui %4 : vector<16x64xi1> to vector<16x64xi32>
    %6 = arith.sitofp %5 : vector<16x64xi32> to vector<16x64xf32>
    %cst = arith.constant dense<0.000000e+00> : vector<16x128xf32>
    %7 = tpu.matmul %6, %1, %cst {dimension_numbers = #tpu.dot_dimension_numbers<[1], [0], [0], [1], [0, 0, 1, 1], [], []>, precision = #tpu.contract_precision<fp32>} : vector<16x64xf32>, vector<64x128xf32>, vector<16x128xf32> -> vector<16x128xf32>
    %c0_3 = arith.constant 0 : index
    %c0_4 = arith.constant 0 : index
    %8 = vector.load %arg3[%c0_3, %c0_4] : memref<16x128xf32, #tpu.memory_space<vmem>>, vector<16x128xf32>
    tpu.vector_store %arg3[%c0_3, %c0_4], %7 {strides = array<i32>} : memref<16x128xf32, #tpu.memory_space<vmem>>, vector<16x128xf32>,
    return
  }
  func.func @transform_0(%arg0: i32) -> (i32, i32) {
    %c0_i32 = arith.constant 0 : i32
    %c0_i32_0 = arith.constant 0 : i32
    return %arg0, %c0_i32 : i32, i32
  }
  func.func @transform_1(%arg0: i32) -> (i32, i32) {
    %c0_i32 = arith.constant 0 : i32
    %c0_i32_0 = arith.constant 0 : i32
    %c0_i32_1 = arith.constant 0 : i32
    return %c0_i32, %c0_i32_0 : i32, i32
  }
  func.func @transform_2(%arg0: i32) -> (i32, i32) {
    %c0_i32 = arith.constant 0 : i32
    %c0_i32_0 = arith.constant 0 : i32
    return %arg0, %c0_i32 : i32, i32
  }
}

</mosaic_0001>

<bundles_post_ra>
// kernel: tpu_custom_call.1
= control target key start
LH: loop header
LB: loop body
LE: loop exit
PB: predicated region body
PF: predicated region fallthrough
CT: control target
= control target key end

     0   :  { %7 = vsyncpa [#allocation3], 0  ;;  %s1100_s0 = inlined_call_operand.vmem [shape: s32[16,1], index: 0, kind: input, shape index: {}]   ;;  %s1101_s1 = inlined_call_operand.hbm [shape: f32[64,128], index: 1, kind: input, shape index: {}]   ;;  %s1102_s2 = inlined_call_operand.hbm [shape: f32[16,128], index: 2, kind: output, shape index: {}]  }
   0x1   :  { %8 = vsyncpa [#allocation4], 0  ;;  %s999_s9 = smov [#allocation2]   ;;  %s951_s13 = scalar_lea.hbm %s1101_s1, 1024 }
   0x2   :  { %s16_s10 = sshll.u32 %s999_s9, 4  ;;  %p952_p0 = scmp.ne.s32.totalorder %s1101_s1, %s951_s13  ;;  %s17_s10 = int_to_ptr.vmem [resolvable:$true] %s16_s10 }
   0x3   :  { %p955_p1 = scmp.lt.u32.totalorder %s951_s13, %s1101_s1 }
   0x5   :  { %p957_p2 = pnand %p955_p1, %p952_p0 }
   0x7   :  { %960 = shalt.err (!%p957_p2)
}
   0x8   :  { %s961_s18 = scalar_lea.vmem %s17_s10, 1024  ;;  %p966_p4 = scmp.lt.s32.totalorder %s17_s10, %s17_s10 }
   0x9   :  { %p962_p3 = scmp.ne.s32.totalorder %s17_s10, %s961_s18  ;;  %p967_p5 = scmp.lt.s32.totalorder %s961_s18, %s961_s18 }
   0xb   :  { %p968_p6 = por %p967_p5, %p966_p4 }
   0xd   :  { %p969_p7 = pnand %p968_p6, %p962_p3 }
   0xf   :  { %972 = shalt.err (!%p969_p7)
}
  0x10   :  { %s1000_s19 = smov 128   ;;  %s1001_s20 = smov 8  }
  0x11   :  { %22 = dma.hbm_to_vmem [thread:$0]  %s1101_s1, 1024, %s17_s10, [#allocation3], %s1000_s19, %s1000_s19, %s1001_s20  }
  0x12   :  { %995 = dma.done.wait [#allocation3], 1024  }
  0x13   :  { %996 = vsyncadd [#allocation3], 4294966272  ;;  %v1002_v0 = vmov 0   ;;  %v26_v1 = vld [vmem:[%s1100_s0] sm:$0xff]  ;;  %v29_v3 = vld [vmem:[#allocation2 + $0x8] sm:$0xff]  ;;  %vm50_vm0 = vcmask 523264  }
  0x14   :  { %950 = vset.pattern.permute.xlu0 %v1002_v0  ;;  %v28_v2 = vld [vmem:[#allocation2] sm:$0xff]  ;;  %v30_v5 = vld [vmem:[#allocation2 + $0x10] sm:$0xff]  ;;  %v31_v6 = vld [vmem:[#allocation2 + $0x18] sm:$0xff]  ;;  %v61_v8 = vand.u32 4294901760, %v29_v3 }
  0x15   :  { %39 = vperm.xlu0 %950, %v26_v1   ;;  %v58_v4 = vand.u32 4294901760, %v28_v2  ;;  %v27_v7 = vld [vmem:[%s1100_s0 + $0x8] sm:$0xff]  ;;  %v64_v9 = vand.u32 4294901760, %v30_v5  ;;  %v67_v10 = vand.u32 4294901760, %v31_v6  ;;  %v32_v11 = vld [vmem:[#allocation2 + $0x20] sm:$0xff]  ;;  %v34_v17 = vld [vmem:[#allocation2 + $0x30] sm:$0xff] }
  0x16   :  { %v33_v12 = vld [vmem:[#allocation2 + $0x28] sm:$0xff]  ;;  %v70_v15 = vand.u32 4294901760, %v32_v11  ;;  %v35_v18 = vld [vmem:[#allocation2 + $0x38] sm:$0xff]  ;;  %v159_v20 = vsub.f32 %v29_v3, %v61_v8  ;;  %v76_v21 = vand.u32 4294901760, %v34_v17  ;;  %v36_v3 = vlaneseq  ;;  %s1004_s0 = smov [#allocation5]  }
  0x17   :  { %v1041_v13 = vpack.c.bf16 %v61_v8, %v58_v4  ;;  %v1043_v14 = vpack.c.bf16 %v67_v10, %v64_v9  ;;  %v73_v16 = vand.u32 4294901760, %v33_v12  ;;  %v152_v19 = vsub.f32 %v28_v2, %v58_v4  ;;  %s644_s1 = sshll.u32 %s1004_s0, 4  ;;  %s645_s1 = int_to_ptr.vmem [resolvable:$true] %s644_s1 }
  0x18   :  { %v79_v22 = vand.u32 4294901760, %v35_v18  ;;  %v160_v24 = vand.u32 4294901760, %v159_v20  ;;  %v166_v28 = vsub.f32 %v30_v5, %v64_v9  ;;  %v173_v29 = vsub.f32 %v31_v6, %v67_v10  ;;  %s973_s27 = scalar_lea.vmem %s645_s1, 256  ;;  %p978_p9 = scmp.lt.s32.totalorder %s645_s1, %s645_s1 }
  0x19   :  { %42 = vperm.xlu0 %950, %v27_v7   ;;  %887 = vmatprep.subr.bf16.mxu0 %v1041_v13  ;;  %v153_v23 = vand.u32 4294901760, %v152_v19  ;;  %v1051_v25 = vpack.c.bf16 %v73_v16, %v70_v15  ;;  %v180_v38 = vsub.f32 %v32_v11, %v70_v15  ;;  %v187_v39 = vsub.f32 %v33_v12, %v73_v16  ;;  %p974_p8 = scmp.ne.s32.totalorder %s645_s1, %s973_s27  ;;  %p979_p10 = scmp.lt.s32.totalorder %s973_s27, %s973_s27 }
  0x1a   :  { %839 = vmatprep.subr.bf16.mxu1 %v1041_v13  ;;  %889 = vmatpush3.bf16.msra.mxu0 %v1041_v13  ;;  %v161_v27 = vsub.f32 %v159_v20, %v160_v24  ;;  %v1055_v30 = vpack.c.bf16 %v79_v22, %v76_v21  ;;  %v167_v33 = vand.u32 4294901760, %v166_v28  ;;  %v174_v34 = vand.u32 4294901760, %v173_v29 }
  0x1b   :  { %841 = vmatpush3.bf16.msra.mxu1 %v1041_v13  ;;  %891 = vmatprep.subr.bf16.mxu0 %v1043_v14  ;;  %v154_v26 = vsub.f32 %v152_v19, %v153_v23  ;;  %v902_v40 = vpack.c.bf16 %v160_v24, %v153_v23  ;;  %v181_v44 = vand.u32 4294901760, %v180_v38  ;;  %v188_v45 = vand.u32 4294901760, %v187_v39  ;;  %p980_p11 = por %p979_p10, %p978_p9 }
  0x1c   :  { %843 = vmatprep.subr.bf16.mxu1 %v1043_v14  ;;  %v162_v32 = vand.u32 4294901760, %v161_v27  ;;  %v1059_v35 = vpack.c.bf16 %v174_v34, %v167_v33  ;;  %v168_v36 = vsub.f32 %v166_v28, %v167_v33  ;;  %v175_v37 = vsub.f32 %v173_v29, %v174_v34 }
  0x1d   :  { %v155_v31 = vand.u32 4294901760, %v154_v26  ;;  %v194_v47 = vsub.f32 %v34_v17, %v76_v21  ;;  %v201_v48 = vsub.f32 %v35_v18, %v79_v22  ;;  %v910_v49 = vpack.c.bf16 %v188_v45, %v181_v44  ;;  %p981_p12 = pnand %p980_p11, %p974_p8 }
  0x1e   :  { %893 = vmatpush3.bf16.msra.mxu0 %v1043_v14  ;;  %v169_v42 = vand.u32 4294901760, %v168_v36  ;;  %v176_v43 = vand.u32 4294901760, %v175_v37  ;;  %v182_v50 = vsub.f32 %v180_v38, %v181_v44  ;;  %v189_v51 = vsub.f32 %v187_v39, %v188_v45 }
  0x1f   :  { %845 = vmatpush3.bf16.msra.mxu1 %v1043_v14  ;;  %895 = vmatprep.subr.bf16.mxu0 %v1051_v25  ;;  %v854_v41 = vpack.c.bf16 %v162_v32, %v155_v31  ;;  %v195_v52 = vand.u32 4294901760, %v194_v47  ;;  %v202_v53 = vand.u32 4294901760, %v201_v48  ;;  %v870_v63 = vpack.c.bf16 %v159_v20, %v152_v19 }
  0x20   :  { %847 = vmatprep.subr.bf16.mxu1 %v1051_v25  ;;  %v858_v46 = vpack.c.bf16 %v176_v43, %v169_v42  ;;  %v183_v54 = vand.u32 4294901760, %v182_v50  ;;  %v190_v55 = vand.u32 4294901760, %v189_v51  ;;  %v874_v0 = vpack.c.bf16 %v173_v29, %v166_v28 }
  0x21   :  { %v914_v56 = vpack.c.bf16 %v202_v53, %v195_v52  ;;  %v196_v57 = vsub.f32 %v194_v47, %v195_v52  ;;  %v203_v58 = vsub.f32 %v201_v48, %v202_v53  ;;  %v878_v1 = vpack.c.bf16 %v187_v39, %v180_v38 }
  0x22   :  { %897 = vmatpush3.bf16.msra.mxu0 %v1051_v25  ;;  %v862_v59 = vpack.c.bf16 %v190_v55, %v183_v54  ;;  %v882_v2 = vpack.c.bf16 %v201_v48, %v194_v47  ;;  %v37_v4 = vand.u32 127, %v36_v3  ;;  %v1003_v6 = vmov 0.0  }
  0x23   :  { %849 = vmatpush3.bf16.msra.mxu1 %v1051_v25  ;;  %899 = vmatprep.subr.bf16.mxu0 %v1055_v30  ;;  %v197_v60 = vand.u32 4294901760, %v196_v57  ;;  %v204_v61 = vand.u32 4294901760, %v203_v58 }
  0x24   :  { %851 = vmatprep.subr.bf16.mxu1 %v1055_v30 }
  0x25   :  { %v866_v62 = vpack.c.bf16 %v204_v61, %v197_v60 }
  0x26   :  { %901 = vmatpush3.bf16.msra.mxu0 %v1055_v30 }
  0x27   :  { %853 = vmatpush3.bf16.msra.mxu1 %v1055_v30  ;;  %903 = vmatprep.subr.bf16.mxu0 %v902_v40 }
  0x28   :  { %855 = vmatprep.subr.bf16.mxu1 %v854_v41 }
  0x94   :  { %v40_v5 = vpop.permute.xlu0 %39 }
  0x95   :  { %vm44_vm1 = vcmp.eq.s32.totalorder %v40_v5, %v37_v4 }
  0x96   :  { %v656_v7 = vsel %vm44_vm1, 1.0, %v1003_v6 }
  0x97   :  { %v52_v8 = vsel %vm50_vm0, %v656_v7, 0 }
  0x98   :  { %v131_v9 = vsub.f32 %v52_v8, %v52_v8  ;;  %v43_v10 = vpop.permute.xlu0 %42 }
  0x99   :  { %vm45_vm2 = vcmp.eq.s32.totalorder %v43_v10, %v37_v4 }
  0x9a   :  { %v657_v11 = vsel %vm45_vm2, 1.0, %v1003_v6  ;;  %v132_v12 = vand.u32 4294901760, %v131_v9 }
  0x9b   :  { %v55_v15 = vsel %vm50_vm0, %v657_v11, 0 }
  0x9c   :  { %v141_v16 = vsub.f32 %v55_v15, %v55_v15  ;;  %797 = vmatprep.mubr.f32.mxu0 %v132_v12  ;;  %v133_v17 = vsub.f32 %v131_v9, %v132_v12 }
  0x9e   :  { %v134_v18 = vand.u32 4294901760, %v133_v17  ;;  %v142_v19 = vand.u32 4294901760, %v141_v16 }
  0xa0   :  { %740 = vmatprep.mubr.f32.mxu1 %v134_v18  ;;  %798 = vmatmul.mubr.f32.vlgmr.msra.gmra.mrb[0].mxu0 %v142_v19  ;;  %v143_v20 = vsub.f32 %v141_v16, %v142_v19 }
  0xa1   :  { %905 = vmatpush3.bf16.msra.mxu0 %v902_v40  ;;  %816 = vmatprep.mubr.msk.f32.mxu0 %vm50_vm0, %v656_v7 }
  0xa2   :  { %907 = vmatprep.subr.bf16.mxu0 %v1059_v35  ;;  %v144_v21 = vand.u32 4294901760, %v143_v20 }
  0xa4   :  { %741 = vmatmul.mubr.f32.vlgmr.msra.gmra.mrb[0].mxu1 %v144_v21 }
  0xa5   :  { %857 = vmatpush3.bf16.msra.mxu1 %v854_v41  ;;  %909 = vmatpush3.bf16.msra.mxu0 %v1059_v35 }
  0xa6   :  { %759 = vmatprep.mubr.msk.f32.mxu1 %vm50_vm0, %v656_v7  ;;  %859 = vmatprep.subr.bf16.mxu1 %v858_v46 }
  0xa7   :  { %911 = vmatprep.subr.bf16.mxu0 %v910_v49 }
  0xa9   :  { %861 = vmatpush3.bf16.msra.mxu1 %v858_v46  ;;  %913 = vmatpush3.bf16.msra.mxu0 %v910_v49 }
  0xaa   :  { %863 = vmatprep.subr.bf16.mxu1 %v862_v59  ;;  %915 = vmatprep.subr.bf16.mxu0 %v914_v56 }
  0xad   :  { %865 = vmatpush3.bf16.msra.mxu1 %v862_v59  ;;  %917 = vmatpush3.bf16.msra.mxu0 %v914_v56 }
  0xae   :  { %867 = vmatprep.subr.bf16.mxu1 %v866_v62  ;;  %919 = vmatprep.subr.bf16.mxu0 %v1041_v13 }
  0xb0   :  { %817 = vmatmul.mubr.msk.f32.vlgmr.msra.gmra.mrb[0].mxu0 %vm50_vm0, %v657_v11 }
  0xb1   :  { %869 = vmatpush3.bf16.msra.mxu1 %v866_v62  ;;  %921 = vmatpush3.bf16.msra.mxu0 %v1041_v13 }
  0xb2   :  { %835 = vmatprep.mubr.msk.f32.mxu0 %vm50_vm0, %v656_v7  ;;  %871 = vmatprep.subr.bf16.mxu1 %v870_v63 }
  0xb3   :  { %923 = vmatprep.subr.bf16.mxu0 %v1043_v14 }
  0xb4   :  { %760 = vmatmul.mubr.msk.f32.vlgmr.msra.gmra.mrb[0].mxu1 %vm50_vm0, %v657_v11 }
  0xb5   :  { %873 = vmatpush3.bf16.msra.mxu1 %v870_v63  ;;  %778 = vmatprep.mubr.f32.mxu1 %v131_v9 }
  0xb6   :  { %925 = vmatpush3.bf16.msra.mxu0 %v1043_v14  ;;  %875 = vmatprep.subr.bf16.mxu1 %v874_v0 }
  0xb7   :  { %927 = vmatprep.subr.bf16.mxu0 %v1051_v25 }
  0xb9   :  { %877 = vmatpush3.bf16.msra.mxu1 %v874_v0 }
  0xba   :  { %929 = vmatpush3.bf16.msra.mxu0 %v1051_v25  ;;  %879 = vmatprep.subr.bf16.mxu1 %v878_v1 }
  0xbb   :  { %931 = vmatprep.subr.bf16.mxu0 %v1055_v30 }
  0xbd   :  { %881 = vmatpush3.bf16.msra.mxu1 %v878_v1 }
  0xbe   :  { %933 = vmatpush3.bf16.msra.mxu0 %v1055_v30  ;;  %883 = vmatprep.subr.bf16.mxu1 %v882_v2 }
  0xc1   :  { %836 = vmatmul.mubr.msk.f32.vlgmr.msra.gmra.mrb[0].mxu0 %vm50_vm0, %v657_v11  ;;  %885 = vmatpush3.bf16.msra.mxu1 %v882_v2 }
  0xc4   :  { %779 = vmatmul.mubr.f32.vlgmr.msra.gmra.mrb[0].mxu1 %v141_v16 }
 0x194   :  { %v837_v13 = vpop.f32.mrb[0].mxu0 }
 0x195   :  { %v627_v22 = vpop.f32.mrb[1].mxu0 }
 0x197   :  { %v780_v14 = vpop.f32.mrb[0].mxu1 }
 0x198   :  { %v934_v23 = vadd.f32 %v837_v13, %v780_v14  ;;  %v351_v24 = vpop.f32.mrb[1].mxu1 }
 0x199   :  { %v935_v26 = vadd.f32 %v627_v22, %v351_v24 }
 0x19a   :  { %638 = vst [vmem:[#allocation5 + $0x8] sm:$0xff] %v934_v23 }
 0x19b   :  { %637 = vst [vmem:[#allocation5] sm:$0xff] %v935_v26 }
 0x19c   :  { %984 = shalt.err (!%p981_p12)
}
 0x19d   :  { %s985_s30 = scalar_lea.hbm %s1102_s2, 256 }
 0x19e   :  { %p986_p13 = scmp.ne.s32.totalorder %s1102_s2, %s985_s30  ;;  %p989_p0 = scmp.lt.u32.totalorder %s985_s30, %s1102_s2 }
 0x1a0   :  { %p991_p1 = pnand %p989_p0, %p986_p13 }
 0x1a2   :  { %994 = shalt.err (!%p991_p1)
}
 0x1a3   :  { %650 = dma.vmem_to_hbm [thread:$0]  %s645_s1, 256, %s1102_s2, [#allocation4], %s1000_s19, %s1000_s19, %s1001_s20  }
 0x1a4   :  { %997 = dma.done.wait [#allocation4], 256  }
 0x1a5   :  { %998 = vsyncadd [#allocation4], 4294967040 }
 0x1a6   :  { %654 = vsyncpa [#allocation3], 1 }
 0x1a7   :  { %655 = vsyncpa [#allocation4], 1 }

</bundles_post_ra>
